<compile_context>
chip_gen: v7x
topology: tpu7x:2x2x1
jax: 0.10.0
libtpu: 0.0.40
codegen_flags: <defaults>
</compile_context>

<pallas_src>
import functools
import math

import numpy as np
import jax
import jax.numpy as jnp
from jax.experimental import pallas as pl
from jax.experimental.pallas import tpu as pltpu


_VMEM_LIMIT = 32 * 1024 * 1024          # safe on v5e/v6e/v7x
_TILE_BUDGET = 8 * 1024 * 1024          # per-block bytes budget (x2 for dbl-buffer)


def _round_up(x, m):
    return ((x + m - 1) // m) * m


def _pick_tile_m(M, row_bytes, max_tile=512):
    """M-tile: multiple of 8, capped, double-buffered blocks fit the budget."""
    tm = min(max_tile, max(8, _TILE_BUDGET // max(2 * row_bytes, 1)))
    tm = max(8, (tm // 8) * 8)
    return min(tm, _round_up(M, 8))


# ----------------------------------------------------------------------------
# Pallas kernels
# ----------------------------------------------------------------------------
def _linear_kernel(x_ref, w_ref, b_ref, o_ref, *, relu):
    y = jnp.dot(x_ref[...], w_ref[...], preferred_element_type=jnp.float32)
    y = y + b_ref[...]
    if relu:
        y = jnp.maximum(y, 0.0)
    o_ref[...] = y.astype(o_ref.dtype)


def pallas_linear(x, w, b, relu=False, max_tile_m=512, compute_dtype=jnp.float32):
    """x: [..., K] @ w: [K, N] + b: [N] -> [..., N] (optionally ReLU).

    Tiled over the flattened leading (row) dimension; weights / bias stay
    resident in VMEM across grid steps.
    """
    lead = x.shape[:-1]
    K = x.shape[-1]
    N = w.shape[1]
    x2 = x.reshape(-1, K).astype(compute_dtype)
    w = w.astype(compute_dtype)
    M = x2.shape[0]

    tm = _pick_tile_m(M, 4 * (K + N), max_tile=max_tile_m)
    Mp = _round_up(M, tm)
    if Mp != M:
        x2 = jnp.pad(x2, ((0, Mp - M), (0, 0)))

    grid = (Mp // tm,)
    cost = pl.CostEstimate(
        flops=2 * Mp * K * N,
        transcendentals=0,
        bytes_accessed=4 * (Mp * K + K * N + N + Mp * N),
    )
    out = pl.pallas_call(
        functools.partial(_linear_kernel, relu=relu),
        out_shape=jax.ShapeDtypeStruct((Mp, N), jnp.float32),
        grid=grid,
        in_specs=[
            pl.BlockSpec((tm, K), lambda i: (i, 0)),
            pl.BlockSpec((K, N), lambda i: (0, 0)),
            pl.BlockSpec((1, N), lambda i: (0, 0)),
        ],
        out_specs=pl.BlockSpec((tm, N), lambda i: (i, 0)),
        compiler_params=pltpu.CompilerParams(
            dimension_semantics=("parallel",),
            vmem_limit_bytes=_VMEM_LIMIT),
        cost_estimate=cost,
    )(x2, w, b.reshape(1, N))
    if Mp != M:
        out = out[:M]
    return out.reshape(*lead, N)


def _fused_head_kernel(x_ref, w0_ref, b0_ref, w1_ref, b1_ref, w2_ref, b2_ref,
                       ik_ref, ir_ref):
    x = x_ref[...]
    # instance_kernels_head: Linear -> ReLU -> Linear
    h = jnp.dot(x, w0_ref[...], preferred_element_type=jnp.float32) + b0_ref[...]
    h = jnp.maximum(h, 0.0)
    ik = jnp.dot(h, w1_ref[...], preferred_element_type=jnp.float32) + b1_ref[...]
    # is_referred_head: Linear
    ir = jnp.dot(x, w2_ref[...], preferred_element_type=jnp.float32) + b2_ref[...]
    ik_ref[...] = ik.astype(ik_ref.dtype)
    ir_ref[...] = ir.astype(ir_ref.dtype)


def pallas_fused_heads(hs, w0, b0, w1, b1, w2, b2,
                       max_tile_m=512, compute_dtype=jnp.float32):
    """One HBM pass over hs producing (instance_kernels, is_referred) jointly."""
    lead = hs.shape[:-1]
    D = hs.shape[-1]
    Dh = w0.shape[1]
    Km = w1.shape[1]
    Kr = w2.shape[1]
    x2 = hs.reshape(-1, D).astype(compute_dtype)
    M = x2.shape[0]

    tm = _pick_tile_m(M, 4 * (D + Dh + Km + Kr), max_tile=max_tile_m)
    Mp = _round_up(M, tm)
    if Mp != M:
        x2 = jnp.pad(x2, ((0, Mp - M), (0, 0)))

    cost = pl.CostEstimate(
        flops=2 * Mp * (D * Dh + Dh * Km + D * Kr),
        transcendentals=0,
        bytes_accessed=4 * (Mp * D + Mp * (Km + Kr)
                            + D * Dh + Dh * Km + D * Kr + Dh + Km + Kr),
    )
    ik, ir = pl.pallas_call(
        _fused_head_kernel,
        out_shape=(jax.ShapeDtypeStruct((Mp, Km), jnp.float32),
                   jax.ShapeDtypeStruct((Mp, Kr), jnp.float32)),
        grid=(Mp // tm,),
        in_specs=[
            pl.BlockSpec((tm, D), lambda i: (i, 0)),
            pl.BlockSpec((D, Dh), lambda i: (0, 0)),
            pl.BlockSpec((1, Dh), lambda i: (0, 0)),
            pl.BlockSpec((Dh, Km), lambda i: (0, 0)),
            pl.BlockSpec((1, Km), lambda i: (0, 0)),
            pl.BlockSpec((D, Kr), lambda i: (0, 0)),
            pl.BlockSpec((1, Kr), lambda i: (0, 0)),
        ],
        out_specs=(pl.BlockSpec((tm, Km), lambda i: (i, 0)),
                   pl.BlockSpec((tm, Kr), lambda i: (i, 0))),
        compiler_params=pltpu.CompilerParams(
            dimension_semantics=("parallel",),
            vmem_limit_bytes=_VMEM_LIMIT),
        cost_estimate=cost,
    )(x2, w0.astype(compute_dtype), b0.reshape(1, Dh),
      w1.astype(compute_dtype), b1.reshape(1, Km),
      w2.astype(compute_dtype), b2.reshape(1, Kr))
    if Mp != M:
        ik = ik[:M]
        ir = ir[:M]
    return ik.reshape(*lead, Km), ir.reshape(*lead, Kr)


def _mask_einsum_kernel(ik_ref, df_ref, o_ref):
    ik = ik_ref[0]                                  # (L*N, C)
    df = df_ref[0]                                  # (HW,  C)
    # contract over C (channels-last decoded features -> NT matmul)
    o_ref[0] = jax.lax.dot_general(
        ik, df, (((1,), (1,)), ((), ())),
        preferred_element_type=jnp.float32).astype(o_ref.dtype)


def pallas_output_masks(instance_kernels, decoded_hw_c, compute_dtype=jnp.float32):
    """einsum('ltbnc,tbchw->ltbnhw') with decoded features kept channels-last.

    Grid iterates over (t b) only; all L decoder layers are collapsed into the
    row dimension of a single (L*N, C) x (HW, C)^T matmul so the decoded
    feature block is DMA'd exactly once.  Returns [T, B, L, N, H*W].
    """
    L, T, B, N, C = instance_kernels.shape
    TB, HW, C2 = decoded_hw_c.shape
    assert C2 == C and TB == T * B
    ik = jnp.transpose(instance_kernels, (1, 2, 0, 3, 4)).reshape(TB, L * N, C)
    ik = ik.astype(compute_dtype)
    df = decoded_hw_c.astype(compute_dtype)

    cost = pl.CostEstimate(
        flops=2 * TB * L * N * C * HW,
        transcendentals=0,
        bytes_accessed=4 * (TB * L * N * C + TB * HW * C + TB * L * N * HW),
    )
    out = pl.pallas_call(
        _mask_einsum_kernel,
        out_shape=jax.ShapeDtypeStruct((TB, L * N, HW), jnp.float32),
        grid=(TB,),
        in_specs=[
            pl.BlockSpec((1, L * N, C), lambda t: (t, 0, 0)),
            pl.BlockSpec((1, HW, C), lambda t: (t, 0, 0)),
        ],
        out_specs=pl.BlockSpec((1, L * N, HW), lambda t: (t, 0, 0)),
        compiler_params=pltpu.CompilerParams(
            dimension_semantics=("parallel",),
            vmem_limit_bytes=_VMEM_LIMIT),
        cost_estimate=cost,
    )(ik, df)
    return out.reshape(T, B, L, N, HW)


def _kernel_loss_kernel(hs_ref, w_ref, o_ref, *, alpha):
    h = hs_ref[...]                                 # (TB, N, C)
    tb, n, c = h.shape
    # score_map = einsum('bnc,cd->bnd'): flatten to one (TB*N, C) x (C, C) matmul
    hflat = h.reshape(tb * n, c)
    s = jnp.dot(hflat, w_ref[...], preferred_element_type=jnp.float32)
    s = s.reshape(tb, n, c)
    # bmm(score_map, hs^T) / sqrt(c): batched Gram matrix, contraction over C
    gram = jax.lax.dot_general(
        s, h, (((2,), (2,)), ((0,), (0,))),
        preferred_element_type=jnp.float32) * (1.0 / math.sqrt(c))   # (TB, N, N)
    row = jax.lax.broadcasted_iota(jnp.int32, (n, n), 0)
    col = jax.lax.broadcasted_iota(jnp.int32, (n, n), 1)
    eye = (row == col).astype(jnp.float32)
    diff = gram - eye[None, :, :]
    loss = jnp.sqrt(jnp.sum(diff * diff, axis=(1, 2)))               # (TB,)
    o_ref[...] = (loss * alpha).reshape(1, tb).astype(o_ref.dtype)


def pallas_object_kernel_loss_w(hs_last, loss_mat, alpha=0.007):
    """object_kernel_loss_w: ||(hs @ W) @ hs^T / sqrt(c) - I||_F * alpha, per (t,b)."""
    T, B, N, C = hs_last.shape
    TB = T * B
    h = hs_last.reshape(TB, N, C)
    out = pl.pallas_call(
        functools.partial(_kernel_loss_kernel, alpha=alpha),
        out_shape=jax.ShapeDtypeStruct((1, TB), jnp.float32),
        grid=(1,),
        in_specs=[
            pl.BlockSpec((TB, N, C), lambda i: (0, 0, 0)),
            pl.BlockSpec((C, C), lambda i: (0, 0)),
        ],
        out_specs=pl.BlockSpec((1, TB), lambda i: (0, 0)),
        compiler_params=pltpu.CompilerParams(
            dimension_semantics=("arbitrary",),
            vmem_limit_bytes=_VMEM_LIMIT),
        cost_estimate=pl.CostEstimate(
            flops=2 * TB * N * C * C + 2 * TB * N * N * C,
            transcendentals=TB,
            bytes_accessed=4 * (TB * N * C + C * C + TB)),
    )(h, loss_mat)
    return out.reshape(T, B, 1, 1)


# ----------------------------------------------------------------------------
# Deterministic parameter init (shapes follow MTTR.__init__)
# ----------------------------------------------------------------------------
def _dense_init(key, fan_in, fan_out):
    kw, kb = jax.random.split(key)
    bound = 1.0 / math.sqrt(fan_in)
    w = jax.random.uniform(kw, (fan_in, fan_out), jnp.float32, -bound, bound)
    b = jax.random.uniform(kb, (fan_out,), jnp.float32, -bound, bound)
    return w, b


def init_params(key, d_model=32, mask_dim=8, num_queries=8, backbone_channels=(4, 8)):
    keys = jax.random.split(key, 12)
    p = {}
    # TODO(synk): real backbone params are external; stand-in 1x1 projections.
    p['backbone_l0_w'], p['backbone_l0_b'] = _dense_init(keys[0], 3, backbone_channels[0])
    p['backbone_l1_w'], p['backbone_l1_b'] = _dense_init(keys[1], 3, backbone_channels[1])
    # vid_embed_proj: Conv2d(backbone_channels[-1], d_model, kernel_size=1)
    p['vid_proj_w'], p['vid_proj_b'] = _dense_init(keys[2], backbone_channels[-1], d_model)
    # instance_kernels_head: MLP(d_model, d_model, mask_dim, num_layers=2)
    p['mlp0_w'], p['mlp0_b'] = _dense_init(keys[3], d_model, d_model)
    p['mlp1_w'], p['mlp1_b'] = _dense_init(keys[4], d_model, mask_dim)
    # is_referred_head: Linear(d_model, 2)
    p['isref_w'], p['isref_b'] = _dense_init(keys[5], d_model, 2)
    # obj_queries: Embedding(num_queries, d_model)
    p['obj_queries'] = jax.random.normal(keys[6], (num_queries, d_model), jnp.float32)
    # TODO(synk): transformer params are external; stand-in conditioning projection.
    p['hs_cond_w'], p['hs_cond_b'] = _dense_init(keys[7], d_model, d_model)
    # TODO(synk): FPNSpatialDecoderV5 params are external; stand-in 1x1 projection.
    p['dec_w'], p['dec_b'] = _dense_init(keys[8], d_model, mask_dim)
    # loss_mat = orthogonal_(randn(mask_dim, mask_dim)) * sqrt(mask_dim)
    a = np.asarray(jax.random.normal(keys[9], (mask_dim, mask_dim), jnp.float32))
    q, r = np.linalg.qr(a)
    q = q * np.sign(np.diag(r))[None, :]
    p['loss_mat'] = jnp.asarray(q * math.sqrt(mask_dim), jnp.float32)
    return p


# ----------------------------------------------------------------------------
# MTTR forward (channels-last internally; public shapes match PyTorch)
# ----------------------------------------------------------------------------
def mttr_forward(params, samples, samples_mask, valid_indices,
                 num_decoder_layers=3, compute_dtype=jnp.float32):
    T0, B, Cin, H, W = samples.shape

    # Single unavoidable format conversion: NCHW -> channels-last.
    x_cl = jnp.transpose(samples, (0, 1, 3, 4, 2))                  # [T0,B,H,W,3]

    # TODO(synk): Video-Swin backbone unavailable; stand-in = (avg-pool + 1x1 conv)
    #             per layer, computed channels-last (no NCHW round trips).
    l0 = pallas_linear(x_cl, params['backbone_l0_w'], params['backbone_l0_b'],
                       compute_dtype=compute_dtype)                 # [T0,B,H,W,C0]
    x_pool = x_cl.reshape(T0, B, H // 2, 2, W // 2, 2, Cin).mean(axis=(3, 5))
    l1 = pallas_linear(x_pool, params['backbone_l1_w'], params['backbone_l1_b'],
                       compute_dtype=compute_dtype)                 # [T0,B,H/2,W/2,C1]
    mask1 = samples_mask[:, :, ::2, ::2]

    # index_select(0, valid_indices) on each backbone layer output
    back0 = jnp.take(l0, valid_indices, axis=0)    # middle layer (FPN stand-in unused)
    back1 = jnp.take(l1, valid_indices, axis=0)
    mask1 = jnp.take(mask1, valid_indices, axis=0)
    T = valid_indices.shape[0]
    Hf, Wf = back1.shape[2], back1.shape[3]
    del back0, mask1   # TODO(synk): would feed FPNSpatialDecoderV5 / transformer pad mask.

    # vid_embed_proj: 1x1 Conv2d, channels-last matmul over (T*B*Hf*Wf, C) rows
    vid = pallas_linear(back1, params['vid_proj_w'], params['vid_proj_b'],
                        compute_dtype=compute_dtype)                # [T,B,Hf,Wf,d]
    d_model = vid.shape[-1]

    # TODO(synk): MultimodalTransformer unavailable; stand-in conditions object queries
    #             on pooled video features to produce hs of shape [L, T, B, N, d_model].
    pooled = vid.mean(axis=(2, 3))                                  # [T,B,d]
    q_cond = pallas_linear(pooled, params['hs_cond_w'], params['hs_cond_b'],
                           compute_dtype=compute_dtype)
    L = num_decoder_layers
    scale = 0.1 * (jnp.arange(L, dtype=jnp.float32) + 1.0)
    hs = (params['obj_queries'][None, None, None, :, :]
          + scale[:, None, None, None, None] * q_cond[None, :, :, None, :])  # [L,T,B,N,d]
    vid_memory = vid                                                # [T,B,Hf,Wf,d]

    # Fused heads: instance_kernels_head (2-layer MLP) + is_referred_head,
    # one HBM pass over hs.
    instance_kernels, outputs_is_referred = pallas_fused_heads(
        hs, params['mlp0_w'], params['mlp0_b'],
        params['mlp1_w'], params['mlp1_b'],
        params['isref_w'], params['isref_b'],
        compute_dtype=compute_dtype)            # [L,T,B,N,K], [L,T,B,N,2]

    # TODO(synk): FPNSpatialDecoderV5 unavailable; stand-in = 1x1 conv of vid_memory
    #             to mask_kernels_dim, kept channels-last as [(T B), H*W, K].
    decoded = pallas_linear(vid_memory.reshape(T * B, Hf * Wf, d_model),
                            params['dec_w'], params['dec_b'],
                            compute_dtype=compute_dtype)            # [(T B),HW,K]

    # output_masks = einsum('ltbnc,tbchw->ltbnhw'); decoded stays channels-last,
    # all L layers collapsed into one matmul per (t,b).
    masks_tbln = pallas_output_masks(instance_kernels, decoded,
                                     compute_dtype=compute_dtype)   # [T,B,L,N,HW]

    out = {
        'pred_masks': masks_tbln[:, :, -1].reshape(T, B, -1, Hf, Wf),   # [T,B,N,Hm,Wm]
        'pred_is_referred': outputs_is_referred[-1],                    # [T,B,N,2]
    }
    out['kernel_loss'] = pallas_object_kernel_loss_w(
        instance_kernels[-1], params['loss_mat'])                       # [T,B,1,1]
    return out


# ----------------------------------------------------------------------------
if __name__ == "__main__":
    key = jax.random.PRNGKey(0)
    k_param, k_samp = jax.random.split(key)

    T0, B, Cin, H, W = 3, 2, 3, 16, 16
    samples = jax.random.normal(k_samp, (T0, B, Cin, H, W), jnp.float32)
    samples_mask = jnp.zeros((T0, B, H, W), dtype=jnp.bool_)
    valid_indices = jnp.array([0, 2], dtype=jnp.int32)

    params = init_params(k_param, d_model=32, mask_dim=8, num_queries=8,
                         backbone_channels=(4, 8))

    out = mttr_forward(params, samples, samples_mask, valid_indices,
                       num_decoder_layers=3)
    jax.block_until_ready(out)

    assert out['pred_masks'].shape == (2, 2, 8, 8, 8)
    assert out['pred_is_referred'].shape == (2, 2, 8, 2)
    assert out['kernel_loss'].shape == (2, 2, 1, 1)
    assert bool(jnp.all(jnp.isfinite(out['pred_masks'])))
    assert bool(jnp.all(jnp.isfinite(out['kernel_loss'])))
    print("KERNEL_OK")
</pallas_src>

<mosaic_0001>
module attributes {stable_mosaic.version = 11 : i64} {
  func.func @_linear_kernel(%arg0: i32, %arg1: memref<512x3xf32, #tpu.memory_space<vmem>>, %arg2: memref<3x4xf32, #tpu.memory_space<vmem>>, %arg3: memref<1x4xf32, #tpu.memory_space<vmem>>, %arg4: memref<512x4xf32, #tpu.memory_space<vmem>>) attributes {dimension_semantics = [#tpu.dimension_semantics<parallel>], iteration_bounds = array<i64: 3>, scalar_prefetch = 0 : i64, scratch_operands = 0 : i64, tpu.core_type = #tpu.core_type<tc>, window_params = [{transform_indices = @transform_0, window_bounds = array<i64: 512, 3>}, {pipeline_mode = #tpu.pipeline_mode<synchronous>, transform_indices = @transform_1, window_bounds = array<i64: 3, 4>}, {pipeline_mode = #tpu.pipeline_mode<synchronous>, transform_indices = @transform_2, window_bounds = array<i64: 1, 4>}, {transform_indices = @transform_3, window_bounds = array<i64: 512, 4>}]} {
    %c0 = arith.constant 0 : index
    %c0_0 = arith.constant 0 : index
    %0 = vector.load %arg1[%c0, %c0_0] : memref<512x3xf32, #tpu.memory_space<vmem>>, vector<512x3xf32>
    %c0_1 = arith.constant 0 : index
    %c0_2 = arith.constant 0 : index
    %1 = vector.load %arg2[%c0_1, %c0_2] : memref<3x4xf32, #tpu.memory_space<vmem>>, vector<3x4xf32>
    %cst = arith.constant dense<0.000000e+00> : vector<512x4xf32>
    %2 = tpu.matmul %0, %1, %cst {dimension_numbers = #tpu.dot_dimension_numbers<[1], [0], [0], [1], [0, 0, 1, 1], [], []>} : vector<512x3xf32>, vector<3x4xf32>, vector<512x4xf32> -> vector<512x4xf32>
    %c0_3 = arith.constant 0 : index
    %c0_4 = arith.constant 0 : index
    %3 = vector.load %arg3[%c0_3, %c0_4] : memref<1x4xf32, #tpu.memory_space<vmem>>, vector<1x4xf32>
    %4 = vector.broadcast %3 : vector<1x4xf32> to vector<512x4xf32>
    %5 = arith.addf %2, %4 : vector<512x4xf32>
    %c0_5 = arith.constant 0 : index
    %c0_6 = arith.constant 0 : index
    %6 = vector.load %arg4[%c0_5, %c0_6] : memref<512x4xf32, #tpu.memory_space<vmem>>, vector<512x4xf32>
    tpu.vector_store %arg4[%c0_5, %c0_6], %5 {strides = array<i32>} : memref<512x4xf32, #tpu.memory_space<vmem>>, vector<512x4xf32>,
    return
  }
  func.func @transform_0(%arg0: i32) -> (i32, i32) {
    %c0_i32 = arith.constant 0 : i32
    %c0_i32_0 = arith.constant 0 : i32
    return %arg0, %c0_i32 : i32, i32
  }
  func.func @transform_1(%arg0: i32) -> (i32, i32) {
    %c0_i32 = arith.constant 0 : i32
    %c0_i32_0 = arith.constant 0 : i32
    %c0_i32_1 = arith.constant 0 : i32
    return %c0_i32, %c0_i32_0 : i32, i32
  }
  func.func @transform_2(%arg0: i32) -> (i32, i32) {
    %c0_i32 = arith.constant 0 : i32
    %c0_i32_0 = arith.constant 0 : i32
    %c0_i32_1 = arith.constant 0 : i32
    return %c0_i32, %c0_i32_0 : i32, i32
  }
  func.func @transform_3(%arg0: i32) -> (i32, i32) {
    %c0_i32 = arith.constant 0 : i32
    %c0_i32_0 = arith.constant 0 : i32
    return %arg0, %c0_i32 : i32, i32
  }
}

</mosaic_0001>

<bundles_post_ra>
// kernel: tpu_custom_call.1
= control target key start
LH: loop header
LB: loop body
LE: loop exit
PB: predicated region body
PF: predicated region fallthrough
CT: control target
= control target key end

     0   :  { %s1227_s12 = smov 0   ;;  %s1583_s0 = inlined_call_operand.vmem [shape: f32[1536,3], index: 0, kind: input, shape index: {}]   ;;  %s1584_s1 = inlined_call_operand.vmem [shape: f32[3,4], index: 1, kind: input, shape index: {}]   ;;  %s1585_s2 = inlined_call_operand.vmem [shape: f32[1,4], index: 2, kind: input, shape index: {}]   ;;  %s1586_s3 = inlined_call_operand.vmem [shape: f32[1536,4], index: 3, kind: output, shape index: {}]  }
   0x1 LB: > { %s949_s13 = sadd.s32 4294967295, %s1205_s12   ;;  %p953_p0 = scmp.ge.s32.totalorder %s1205_s12, 1  ;;  %s1205_s12 = sphi %s1227_s12, %s13_s12  }
   0x2   : > { %p138_p1 = scmp.lt.s32.totalorder %s1205_s12, 4 }
   0x4   : > { %p139_p2 = pnand %p953_p0, %p138_p1 }
   0x5   : > { %v238_v0 = vld [vmem:[%s1584_s1] sm:$0x7] (!%p139_p2)  ;;  %vm439_vm0 = vcmask (!%p139_p2), 1042432   ;;  %s954_s16 = sshll.u32 (!%p139_p2), %s949_s13, 6  ;;  %vm246_vm1 = vcmask (!%p139_p2), 23552   ;;  %vm828_vm2 = vcmask (!%p139_p2), 31744  }
   0x6   : > { %142 = sbr.rel (%p139_p2) target bundleno = 295 (0x127), region = 32  ;;  %1091 = vmatprep.subr.msk.mxu0 (!%p139_p2), %vm439_vm0, %v238_v0  ;;  %1189 = vmatprep.subr.msk.mxu1 (!%p139_p2), %vm439_vm0, %v238_v0  ;;  %p163_p3 = scmp.lt.s32.totalorder (!%p139_p2), %s954_s16, 191 }
   0x7   : > { %1092 = vmatpush3.msk.msra.mxu0 (!%p139_p2), %vm439_vm0, %v238_v0  ;;  %1190 = vmatpush3.msk.msra.mxu1 (!%p139_p2), %vm439_vm0, %v238_v0 }
   0xd   : > { %s1588_s16 = smov (!%p163_p3, %s954_s16), 191 }
   0xe   : > { %s955_s17 = sshll.u32 %s1588_s16, 3 }
   0xf   : > { %s1246_s20 = scalar_lea.vmem %s1583_s0, %s955_s17  ;;  %s1386_s25 = scalar_lea.vmem %s1586_s3, %s955_s17 }
  0x10   : > { %v174_v1 = vld [vmem:[%s1246_s20] sm:$0xff]  ;;  %v175_v3 = vld [vmem:[%s1246_s20 + $0x8] sm:$0xff]  ;;  %v176_v5 = vld [vmem:[%s1246_s20 + $0x10] sm:$0xff] }
  0x11   : > { %v206_v2 = vld [vmem:[%s1246_s20 + $0x100] sm:$0xff]  ;;  %1093 = vmatprep.mubr.msk.f32.mxu0 %vm246_vm1, %v174_v1  ;;  %v207_v4 = vld [vmem:[%s1246_s20 + $0x108] sm:$0xff]  ;;  %v208_v6 = vld [vmem:[%s1246_s20 + $0x110] sm:$0xff] }
  0x12   : > { %1141 = vmatprep.mubr.msk.f32.mxu1 %vm246_vm1, %v206_v2  ;;  %1094 = vmatmul.mubr.msk.f32.vlgmr.msra.gmra.mrb[0].mxu0 %vm246_vm1, %v175_v3  ;;  %v177_v7 = vld [vmem:[%s1246_s20 + $0x18] sm:$0xff]  ;;  %v178_v9 = vld [vmem:[%s1246_s20 + $0x20] sm:$0xff]  ;;  %v179_v11 = vld [vmem:[%s1246_s20 + $0x28] sm:$0xff] }
  0x13   : > { %1142 = vmatmul.mubr.msk.f32.vlgmr.msra.gmra.mrb[0].mxu1 %vm246_vm1, %v207_v4  ;;  %1096 = vmatprep.mubr.msk.f32.mxu0 %vm246_vm1, %v176_v5  ;;  %v209_v8 = vld [vmem:[%s1246_s20 + $0x118] sm:$0xff]  ;;  %v210_v10 = vld [vmem:[%s1246_s20 + $0x120] sm:$0xff]  ;;  %v211_v12 = vld [vmem:[%s1246_s20 + $0x128] sm:$0xff] }
  0x14   : > { %1144 = vmatprep.mubr.msk.f32.mxu1 %vm246_vm1, %v208_v6  ;;  %v180_v13 = vld [vmem:[%s1246_s20 + $0x30] sm:$0xff]  ;;  %v181_v15 = vld [vmem:[%s1246_s20 + $0x38] sm:$0xff]  ;;  %v182_v17 = vld [vmem:[%s1246_s20 + $0x40] sm:$0xff] }
  0x15   : > { %v212_v14 = vld [vmem:[%s1246_s20 + $0x130] sm:$0xff]  ;;  %v213_v16 = vld [vmem:[%s1246_s20 + $0x138] sm:$0xff]  ;;  %v214_v18 = vld [vmem:[%s1246_s20 + $0x140] sm:$0xff] }
  0x16   : > { %1097 = vmatmul.mubr.msk.f32.gmra.mrb[2].mxu0 %vm246_vm1, %v177_v7  ;;  %v183_v19 = vld [vmem:[%s1246_s20 + $0x48] sm:$0xff]  ;;  %v184_v21 = vld [vmem:[%s1246_s20 + $0x50] sm:$0xff]  ;;  %v185_v23 = vld [vmem:[%s1246_s20 + $0x58] sm:$0xff] }
  0x17   : > { %1145 = vmatmul.mubr.msk.f32.gmra.mrb[2].mxu1 %vm246_vm1, %v209_v8  ;;  %1099 = vmatprep.mubr.msk.f32.mxu0 %vm246_vm1, %v178_v9  ;;  %v215_v20 = vld [vmem:[%s1246_s20 + $0x148] sm:$0xff]  ;;  %v216_v22 = vld [vmem:[%s1246_s20 + $0x150] sm:$0xff]  ;;  %v217_v24 = vld [vmem:[%s1246_s20 + $0x158] sm:$0xff] }
  0x18   : > { %1147 = vmatprep.mubr.msk.f32.mxu1 %vm246_vm1, %v210_v10  ;;  %v186_v25 = vld [vmem:[%s1246_s20 + $0x60] sm:$0xff]  ;;  %v187_v27 = vld [vmem:[%s1246_s20 + $0x68] sm:$0xff]  ;;  %v188_v29 = vld [vmem:[%s1246_s20 + $0x70] sm:$0xff] }
  0x19   : > { %v218_v26 = vld [vmem:[%s1246_s20 + $0x160] sm:$0xff]  ;;  %v219_v28 = vld [vmem:[%s1246_s20 + $0x168] sm:$0xff]  ;;  %v220_v30 = vld [vmem:[%s1246_s20 + $0x170] sm:$0xff] }
  0x1a   : > { %1100 = vmatmul.mubr.msk.f32.gmra.mrb[4].mxu0 %vm246_vm1, %v179_v11  ;;  %v189_v31 = vld [vmem:[%s1246_s20 + $0x78] sm:$0xff]  ;;  %v190_v33 = vld [vmem:[%s1246_s20 + $0x80] sm:$0xff]  ;;  %v191_v35 = vld [vmem:[%s1246_s20 + $0x88] sm:$0xff] }
  0x1b   : > { %1148 = vmatmul.mubr.msk.f32.gmra.mrb[4].mxu1 %vm246_vm1, %v211_v12  ;;  %1102 = vmatprep.mubr.msk.f32.mxu0 %vm246_vm1, %v180_v13  ;;  %v221_v32 = vld [vmem:[%s1246_s20 + $0x178] sm:$0xff]  ;;  %v222_v34 = vld [vmem:[%s1246_s20 + $0x180] sm:$0xff]  ;;  %v223_v36 = vld [vmem:[%s1246_s20 + $0x188] sm:$0xff] }
  0x1c   : > { %1150 = vmatprep.mubr.msk.f32.mxu1 %vm246_vm1, %v212_v14  ;;  %v192_v37 = vld [vmem:[%s1246_s20 + $0x90] sm:$0xff]  ;;  %v193_v39 = vld [vmem:[%s1246_s20 + $0x98] sm:$0xff]  ;;  %v194_v41 = vld [vmem:[%s1246_s20 + $0xa0] sm:$0xff] }
  0x1d   : > { %v224_v38 = vld [vmem:[%s1246_s20 + $0x190] sm:$0xff]  ;;  %v225_v40 = vld [vmem:[%s1246_s20 + $0x198] sm:$0xff]  ;;  %v226_v42 = vld [vmem:[%s1246_s20 + $0x1a0] sm:$0xff] }
  0x1e   : > { %1103 = vmatmul.mubr.msk.f32.gmra.mrb[6].mxu0 %vm246_vm1, %v181_v15  ;;  %v195_v43 = vld [vmem:[%s1246_s20 + $0xa8] sm:$0xff]  ;;  %v196_v45 = vld [vmem:[%s1246_s20 + $0xb0] sm:$0xff]  ;;  %v197_v47 = vld [vmem:[%s1246_s20 + $0xb8] sm:$0xff] }
  0x1f   : > { %1151 = vmatmul.mubr.msk.f32.gmra.mrb[6].mxu1 %vm246_vm1, %v213_v16  ;;  %1105 = vmatprep.mubr.msk.f32.mxu0 %vm246_vm1, %v182_v17  ;;  %v227_v44 = vld [vmem:[%s1246_s20 + $0x1a8] sm:$0xff]  ;;  %v228_v46 = vld [vmem:[%s1246_s20 + $0x1b0] sm:$0xff]  ;;  %v229_v48 = vld [vmem:[%s1246_s20 + $0x1b8] sm:$0xff] }
  0x20   : > { %1153 = vmatprep.mubr.msk.f32.mxu1 %vm246_vm1, %v214_v18  ;;  %v198_v49 = vld [vmem:[%s1246_s20 + $0xc0] sm:$0xff]  ;;  %v199_v51 = vld [vmem:[%s1246_s20 + $0xc8] sm:$0xff]  ;;  %v200_v53 = vld [vmem:[%s1246_s20 + $0xd0] sm:$0xff] }
  0x21   : > { %v230_v50 = vld [vmem:[%s1246_s20 + $0x1c0] sm:$0xff]  ;;  %v231_v52 = vld [vmem:[%s1246_s20 + $0x1c8] sm:$0xff]  ;;  %v232_v54 = vld [vmem:[%s1246_s20 + $0x1d0] sm:$0xff] }
  0x22   : > { %1106 = vmatmul.mubr.msk.f32.gmra.mrb[8].mxu0 %vm246_vm1, %v183_v19  ;;  %v201_v55 = vld [vmem:[%s1246_s20 + $0xd8] sm:$0xff]  ;;  %v202_v57 = vld [vmem:[%s1246_s20 + $0xe0] sm:$0xff]  ;;  %v203_v59 = vld [vmem:[%s1246_s20 + $0xe8] sm:$0xff] }
  0x23   : > { %1154 = vmatmul.mubr.msk.f32.gmra.mrb[8].mxu1 %vm246_vm1, %v215_v20  ;;  %1108 = vmatprep.mubr.msk.f32.mxu0 %vm246_vm1, %v184_v21  ;;  %v233_v56 = vld [vmem:[%s1246_s20 + $0x1d8] sm:$0xff]  ;;  %v234_v58 = vld [vmem:[%s1246_s20 + $0x1e0] sm:$0xff]  ;;  %v235_v60 = vld [vmem:[%s1246_s20 + $0x1e8] sm:$0xff] }
  0x24   : > { %1156 = vmatprep.mubr.msk.f32.mxu1 %vm246_vm1, %v216_v22  ;;  %v204_v61 = vld [vmem:[%s1246_s20 + $0xf0] sm:$0xff]  ;;  %v205_v63 = vld [vmem:[%s1246_s20 + $0xf8] sm:$0xff]  ;;  %v1379_v1 = vld [vmem:[%s1585_s2] ss:$0 sm:$0xff] }
  0x25   : > { %v236_v62 = vld [vmem:[%s1246_s20 + $0x1f0] sm:$0xff]  ;;  %v237_v0 = vld [vmem:[%s1246_s20 + $0x1f8] sm:$0xff] }
  0x26   : > { %1109 = vmatmul.mubr.msk.f32.gmra.mrb[10].mxu0 %vm246_vm1, %v185_v23 }
  0x27   : > { %1157 = vmatmul.mubr.msk.f32.gmra.mrb[10].mxu1 %vm246_vm1, %v217_v24  ;;  %1111 = vmatprep.mubr.msk.f32.mxu0 %vm246_vm1, %v186_v25 }
  0x28   : > { %1159 = vmatprep.mubr.msk.f32.mxu1 %vm246_vm1, %v218_v26 }
  0x2a   : > { %1112 = vmatmul.mubr.msk.f32.gmra.mrb[12].mxu0 %vm246_vm1, %v187_v27 }
  0x2b   : > { %1160 = vmatmul.mubr.msk.f32.gmra.mrb[12].mxu1 %vm246_vm1, %v219_v28  ;;  %1114 = vmatprep.mubr.msk.f32.mxu0 %vm246_vm1, %v188_v29 }
  0x2c   : > { %1162 = vmatprep.mubr.msk.f32.mxu1 %vm246_vm1, %v220_v30 }
  0x2e   : > { %1115 = vmatmul.mubr.msk.f32.gmra.mrb[14].mxu0 %vm246_vm1, %v189_v31 }
  0x2f   : > { %1163 = vmatmul.mubr.msk.f32.gmra.mrb[14].mxu1 %vm246_vm1, %v221_v32  ;;  %1117 = vmatprep.mubr.msk.f32.mxu0 %vm246_vm1, %v190_v33 }
  0x30   : > { %1165 = vmatprep.mubr.msk.f32.mxu1 %vm246_vm1, %v222_v34 }
  0x32   : > { %1118 = vmatmul.mubr.msk.f32.gmra.mrb[16].mxu0 %vm246_vm1, %v191_v35 }
  0x33   : > { %1166 = vmatmul.mubr.msk.f32.gmra.mrb[16].mxu1 %vm246_vm1, %v223_v36  ;;  %1120 = vmatprep.mubr.msk.f32.mxu0 %vm246_vm1, %v192_v37 }
  0x34   : > { %1168 = vmatprep.mubr.msk.f32.mxu1 %vm246_vm1, %v224_v38 }
  0x36   : > { %1121 = vmatmul.mubr.msk.f32.gmra.mrb[18].mxu0 %vm246_vm1, %v193_v39 }
  0x37   : > { %1169 = vmatmul.mubr.msk.f32.gmra.mrb[18].mxu1 %vm246_vm1, %v225_v40  ;;  %1123 = vmatprep.mubr.msk.f32.mxu0 %vm246_vm1, %v194_v41 }
  0x38   : > { %1171 = vmatprep.mubr.msk.f32.mxu1 %vm246_vm1, %v226_v42 }
  0x3a   : > { %1124 = vmatmul.mubr.msk.f32.gmra.mrb[20].mxu0 %vm246_vm1, %v195_v43 }
  0x3b   : > { %1172 = vmatmul.mubr.msk.f32.gmra.mrb[20].mxu1 %vm246_vm1, %v227_v44  ;;  %1126 = vmatprep.mubr.msk.f32.mxu0 %vm246_vm1, %v196_v45 }
  0x3c   : > { %1174 = vmatprep.mubr.msk.f32.mxu1 %vm246_vm1, %v228_v46 }
  0x3e   : > { %1127 = vmatmul.mubr.msk.f32.gmra.mrb[22].mxu0 %vm246_vm1, %v197_v47 }
  0x3f   : > { %1175 = vmatmul.mubr.msk.f32.gmra.mrb[22].mxu1 %vm246_vm1, %v229_v48  ;;  %1129 = vmatprep.mubr.msk.f32.mxu0 %vm246_vm1, %v198_v49 }
  0x40   : > { %1177 = vmatprep.mubr.msk.f32.mxu1 %vm246_vm1, %v230_v50 }
  0x42   : > { %1130 = vmatmul.mubr.msk.f32.gmra.mrb[24].mxu0 %vm246_vm1, %v199_v51 }
  0x43   : > { %1178 = vmatmul.mubr.msk.f32.gmra.mrb[24].mxu1 %vm246_vm1, %v231_v52  ;;  %1132 = vmatprep.mubr.msk.f32.mxu0 %vm246_vm1, %v200_v53 }
  0x44   : > { %1180 = vmatprep.mubr.msk.f32.mxu1 %vm246_vm1, %v232_v54 }
  0x46   : > { %1133 = vmatmul.mubr.msk.f32.gmra.mrb[26].mxu0 %vm246_vm1, %v201_v55 }
  0x47   : > { %1181 = vmatmul.mubr.msk.f32.gmra.mrb[26].mxu1 %vm246_vm1, %v233_v56  ;;  %1135 = vmatprep.mubr.msk.f32.mxu0 %vm246_vm1, %v202_v57 }
  0x48   : > { %1183 = vmatprep.mubr.msk.f32.mxu1 %vm246_vm1, %v234_v58 }
  0x4a   : > { %1136 = vmatmul.mubr.msk.f32.gmra.mrb[28].mxu0 %vm246_vm1, %v203_v59 }
  0x4b   : > { %1184 = vmatmul.mubr.msk.f32.gmra.mrb[28].mxu1 %vm246_vm1, %v235_v60  ;;  %1138 = vmatprep.mubr.msk.f32.mxu0 %vm246_vm1, %v204_v61 }
  0x4c   : > { %1186 = vmatprep.mubr.msk.f32.mxu1 %vm246_vm1, %v236_v62 }
  0x4e   : > { %1139 = vmatmul.mubr.msk.f32.gmra.mrb[30].mxu0 %vm246_vm1, %v205_v63 }
  0x4f   : > { %1187 = vmatmul.mubr.msk.f32.gmra.mrb[30].mxu1 %vm246_vm1, %v237_v0 }
  0xe5   : > { %v1095_v2 = vpop.f32.mrb[0].mxu0 }
  0xe6   : > { %v1143_v3 = vpop.f32.mrb[0].mxu1  ;;  %v515_v4 = vadd.f32 %v1095_v2, %v1379_v1  ;;  %v509_v6 = vpop.f32.mrb[1].mxu0 }
  0xe7   : > { %v675_v5 = vadd.f32 %v1143_v3, %v1379_v1  ;;  %v669_v7 = vpop.f32.mrb[1].mxu1  ;;  %v510_v8 = vadd.f32 %v1379_v1, %v509_v6 }
  0xe8   : > { %v670_v9 = vadd.f32 %v1379_v1, %v669_v7  ;;  %830 = vst.msk [vmem:[%s1386_s25 + $0x8] sm:$0xff] %vm828_vm2, %v515_v4 }
  0xe9   : > { %862 = vst.msk [vmem:[%s1386_s25 + $0x108] sm:$0xff] %vm828_vm2, %v675_v5  ;;  %829 = vst.msk [vmem:[%s1386_s25] sm:$0xff] %vm828_vm2, %v510_v8  ;;  %v1098_v10 = vpop.f32.mrb[2].mxu0 }
  0xea   : > { %861 = vst.msk [vmem:[%s1386_s25 + $0x100] sm:$0xff] %vm828_vm2, %v670_v9  ;;  %v1146_v11 = vpop.f32.mrb[2].mxu1  ;;  %v525_v12 = vadd.f32 %v1098_v10, %v1379_v1  ;;  %v519_v14 = vpop.f32.mrb[3].mxu0 }
  0xeb   : > { %v685_v13 = vadd.f32 %v1146_v11, %v1379_v1  ;;  %v679_v15 = vpop.f32.mrb[3].mxu1  ;;  %v520_v16 = vadd.f32 %v1379_v1, %v519_v14 }
  0xec   : > { %v680_v17 = vadd.f32 %v1379_v1, %v679_v15  ;;  %832 = vst.msk [vmem:[%s1386_s25 + $0x18] sm:$0xff] %vm828_vm2, %v525_v12 }
  0xed   : > { %864 = vst.msk [vmem:[%s1386_s25 + $0x118] sm:$0xff] %vm828_vm2, %v685_v13  ;;  %831 = vst.msk [vmem:[%s1386_s25 + $0x10] sm:$0xff] %vm828_vm2, %v520_v16  ;;  %v1101_v18 = vpop.f32.mrb[4].mxu0 }
  0xee   : > { %863 = vst.msk [vmem:[%s1386_s25 + $0x110] sm:$0xff] %vm828_vm2, %v680_v17  ;;  %v1149_v19 = vpop.f32.mrb[4].mxu1  ;;  %v535_v20 = vadd.f32 %v1101_v18, %v1379_v1  ;;  %v529_v22 = vpop.f32.mrb[5].mxu0 }
  0xef   : > { %v695_v21 = vadd.f32 %v1149_v19, %v1379_v1  ;;  %v689_v23 = vpop.f32.mrb[5].mxu1  ;;  %v530_v24 = vadd.f32 %v1379_v1, %v529_v22 }
  0xf0   : > { %v690_v25 = vadd.f32 %v1379_v1, %v689_v23  ;;  %834 = vst.msk [vmem:[%s1386_s25 + $0x28] sm:$0xff] %vm828_vm2, %v535_v20 }
  0xf1   : > { %866 = vst.msk [vmem:[%s1386_s25 + $0x128] sm:$0xff] %vm828_vm2, %v695_v21  ;;  %833 = vst.msk [vmem:[%s1386_s25 + $0x20] sm:$0xff] %vm828_vm2, %v530_v24  ;;  %v1104_v26 = vpop.f32.mrb[6].mxu0 }
  0xf2   : > { %865 = vst.msk [vmem:[%s1386_s25 + $0x120] sm:$0xff] %vm828_vm2, %v690_v25  ;;  %v1152_v27 = vpop.f32.mrb[6].mxu1  ;;  %v545_v28 = vadd.f32 %v1104_v26, %v1379_v1  ;;  %v539_v30 = vpop.f32.mrb[7].mxu0 }
  0xf3   : > { %v705_v29 = vadd.f32 %v1152_v27, %v1379_v1  ;;  %v699_v31 = vpop.f32.mrb[7].mxu1  ;;  %v540_v32 = vadd.f32 %v1379_v1, %v539_v30 }
  0xf4   : > { %v700_v33 = vadd.f32 %v1379_v1, %v699_v31  ;;  %836 = vst.msk [vmem:[%s1386_s25 + $0x38] sm:$0xff] %vm828_vm2, %v545_v28 }
  0xf5   : > { %868 = vst.msk [vmem:[%s1386_s25 + $0x138] sm:$0xff] %vm828_vm2, %v705_v29  ;;  %835 = vst.msk [vmem:[%s1386_s25 + $0x30] sm:$0xff] %vm828_vm2, %v540_v32  ;;  %v1107_v34 = vpop.f32.mrb[8].mxu0 }
  0xf6   : > { %867 = vst.msk [vmem:[%s1386_s25 + $0x130] sm:$0xff] %vm828_vm2, %v700_v33  ;;  %v1155_v35 = vpop.f32.mrb[8].mxu1  ;;  %v555_v36 = vadd.f32 %v1107_v34, %v1379_v1  ;;  %v549_v38 = vpop.f32.mrb[9].mxu0 }
  0xf7   : > { %v715_v37 = vadd.f32 %v1155_v35, %v1379_v1  ;;  %v709_v39 = vpop.f32.mrb[9].mxu1  ;;  %v550_v40 = vadd.f32 %v1379_v1, %v549_v38 }
  0xf8   : > { %v710_v41 = vadd.f32 %v1379_v1, %v709_v39  ;;  %838 = vst.msk [vmem:[%s1386_s25 + $0x48] sm:$0xff] %vm828_vm2, %v555_v36 }
  0xf9   : > { %870 = vst.msk [vmem:[%s1386_s25 + $0x148] sm:$0xff] %vm828_vm2, %v715_v37  ;;  %837 = vst.msk [vmem:[%s1386_s25 + $0x40] sm:$0xff] %vm828_vm2, %v550_v40  ;;  %v1110_v42 = vpop.f32.mrb[10].mxu0 }
  0xfa   : > { %869 = vst.msk [vmem:[%s1386_s25 + $0x140] sm:$0xff] %vm828_vm2, %v710_v41  ;;  %v1158_v43 = vpop.f32.mrb[10].mxu1  ;;  %v565_v44 = vadd.f32 %v1110_v42, %v1379_v1  ;;  %v559_v46 = vpop.f32.mrb[11].mxu0 }
  0xfb   : > { %v725_v45 = vadd.f32 %v1158_v43, %v1379_v1  ;;  %v719_v47 = vpop.f32.mrb[11].mxu1  ;;  %v560_v48 = vadd.f32 %v1379_v1, %v559_v46 }
  0xfc   : > { %v720_v49 = vadd.f32 %v1379_v1, %v719_v47  ;;  %840 = vst.msk [vmem:[%s1386_s25 + $0x58] sm:$0xff] %vm828_vm2, %v565_v44 }
  0xfd   : > { %872 = vst.msk [vmem:[%s1386_s25 + $0x158] sm:$0xff] %vm828_vm2, %v725_v45  ;;  %839 = vst.msk [vmem:[%s1386_s25 + $0x50] sm:$0xff] %vm828_vm2, %v560_v48  ;;  %v1113_v50 = vpop.f32.mrb[12].mxu0 }
  0xfe   : > { %871 = vst.msk [vmem:[%s1386_s25 + $0x150] sm:$0xff] %vm828_vm2, %v720_v49  ;;  %v1161_v51 = vpop.f32.mrb[12].mxu1  ;;  %v575_v52 = vadd.f32 %v1113_v50, %v1379_v1  ;;  %v569_v54 = vpop.f32.mrb[13].mxu0 }
  0xff   : > { %v735_v53 = vadd.f32 %v1161_v51, %v1379_v1  ;;  %v729_v55 = vpop.f32.mrb[13].mxu1  ;;  %v570_v56 = vadd.f32 %v1379_v1, %v569_v54 }
 0x100   : > { %v730_v57 = vadd.f32 %v1379_v1, %v729_v55  ;;  %842 = vst.msk [vmem:[%s1386_s25 + $0x68] sm:$0xff] %vm828_vm2, %v575_v52 }
 0x101   : > { %874 = vst.msk [vmem:[%s1386_s25 + $0x168] sm:$0xff] %vm828_vm2, %v735_v53  ;;  %841 = vst.msk [vmem:[%s1386_s25 + $0x60] sm:$0xff] %vm828_vm2, %v570_v56  ;;  %v1116_v58 = vpop.f32.mrb[14].mxu0 }
 0x102   : > { %873 = vst.msk [vmem:[%s1386_s25 + $0x160] sm:$0xff] %vm828_vm2, %v730_v57  ;;  %v1164_v59 = vpop.f32.mrb[14].mxu1  ;;  %v585_v60 = vadd.f32 %v1116_v58, %v1379_v1  ;;  %v579_v62 = vpop.f32.mrb[15].mxu0 }
 0x103   : > { %v745_v61 = vadd.f32 %v1164_v59, %v1379_v1  ;;  %v739_v63 = vpop.f32.mrb[15].mxu1  ;;  %v580_v0 = vadd.f32 %v1379_v1, %v579_v62 }
 0x104   : > { %v740_v2 = vadd.f32 %v1379_v1, %v739_v63  ;;  %844 = vst.msk [vmem:[%s1386_s25 + $0x78] sm:$0xff] %vm828_vm2, %v585_v60 }
 0x105   : > { %876 = vst.msk [vmem:[%s1386_s25 + $0x178] sm:$0xff] %vm828_vm2, %v745_v61  ;;  %843 = vst.msk [vmem:[%s1386_s25 + $0x70] sm:$0xff] %vm828_vm2, %v580_v0  ;;  %v1119_v3 = vpop.f32.mrb[16].mxu0 }
 0x106   : > { %875 = vst.msk [vmem:[%s1386_s25 + $0x170] sm:$0xff] %vm828_vm2, %v740_v2  ;;  %v1167_v4 = vpop.f32.mrb[16].mxu1  ;;  %v595_v5 = vadd.f32 %v1119_v3, %v1379_v1  ;;  %v589_v7 = vpop.f32.mrb[17].mxu0 }
 0x107   : > { %v755_v6 = vadd.f32 %v1167_v4, %v1379_v1  ;;  %v749_v8 = vpop.f32.mrb[17].mxu1  ;;  %v590_v9 = vadd.f32 %v1379_v1, %v589_v7 }
 0x108   : > { %v750_v10 = vadd.f32 %v1379_v1, %v749_v8  ;;  %846 = vst.msk [vmem:[%s1386_s25 + $0x88] sm:$0xff] %vm828_vm2, %v595_v5 }
 0x109   : > { %878 = vst.msk [vmem:[%s1386_s25 + $0x188] sm:$0xff] %vm828_vm2, %v755_v6  ;;  %845 = vst.msk [vmem:[%s1386_s25 + $0x80] sm:$0xff] %vm828_vm2, %v590_v9  ;;  %v1122_v11 = vpop.f32.mrb[18].mxu0 }
 0x10a   : > { %877 = vst.msk [vmem:[%s1386_s25 + $0x180] sm:$0xff] %vm828_vm2, %v750_v10  ;;  %v1170_v12 = vpop.f32.mrb[18].mxu1  ;;  %v605_v13 = vadd.f32 %v1122_v11, %v1379_v1  ;;  %v599_v15 = vpop.f32.mrb[19].mxu0 }
 0x10b   : > { %v765_v14 = vadd.f32 %v1170_v12, %v1379_v1  ;;  %v759_v16 = vpop.f32.mrb[19].mxu1  ;;  %v600_v17 = vadd.f32 %v1379_v1, %v599_v15 }
 0x10c   : > { %v760_v18 = vadd.f32 %v1379_v1, %v759_v16  ;;  %848 = vst.msk [vmem:[%s1386_s25 + $0x98] sm:$0xff] %vm828_vm2, %v605_v13 }
 0x10d   : > { %880 = vst.msk [vmem:[%s1386_s25 + $0x198] sm:$0xff] %vm828_vm2, %v765_v14  ;;  %847 = vst.msk [vmem:[%s1386_s25 + $0x90] sm:$0xff] %vm828_vm2, %v600_v17  ;;  %v1125_v19 = vpop.f32.mrb[20].mxu0 }
 0x10e   : > { %879 = vst.msk [vmem:[%s1386_s25 + $0x190] sm:$0xff] %vm828_vm2, %v760_v18  ;;  %v1173_v20 = vpop.f32.mrb[20].mxu1  ;;  %v615_v21 = vadd.f32 %v1125_v19, %v1379_v1  ;;  %v609_v23 = vpop.f32.mrb[21].mxu0 }
 0x10f   : > { %v775_v22 = vadd.f32 %v1173_v20, %v1379_v1  ;;  %v769_v24 = vpop.f32.mrb[21].mxu1  ;;  %v610_v25 = vadd.f32 %v1379_v1, %v609_v23 }
 0x110   : > { %v770_v26 = vadd.f32 %v1379_v1, %v769_v24  ;;  %850 = vst.msk [vmem:[%s1386_s25 + $0xa8] sm:$0xff] %vm828_vm2, %v615_v21 }
 0x111   : > { %882 = vst.msk [vmem:[%s1386_s25 + $0x1a8] sm:$0xff] %vm828_vm2, %v775_v22  ;;  %849 = vst.msk [vmem:[%s1386_s25 + $0xa0] sm:$0xff] %vm828_vm2, %v610_v25  ;;  %v1128_v27 = vpop.f32.mrb[22].mxu0 }
 0x112   : > { %881 = vst.msk [vmem:[%s1386_s25 + $0x1a0] sm:$0xff] %vm828_vm2, %v770_v26  ;;  %v1176_v28 = vpop.f32.mrb[22].mxu1  ;;  %v625_v29 = vadd.f32 %v1128_v27, %v1379_v1  ;;  %v619_v31 = vpop.f32.mrb[23].mxu0 }
 0x113   : > { %v785_v30 = vadd.f32 %v1176_v28, %v1379_v1  ;;  %v779_v32 = vpop.f32.mrb[23].mxu1  ;;  %v620_v33 = vadd.f32 %v1379_v1, %v619_v31 }
 0x114   : > { %v780_v34 = vadd.f32 %v1379_v1, %v779_v32  ;;  %852 = vst.msk [vmem:[%s1386_s25 + $0xb8] sm:$0xff] %vm828_vm2, %v625_v29 }
 0x115   : > { %884 = vst.msk [vmem:[%s1386_s25 + $0x1b8] sm:$0xff] %vm828_vm2, %v785_v30  ;;  %851 = vst.msk [vmem:[%s1386_s25 + $0xb0] sm:$0xff] %vm828_vm2, %v620_v33  ;;  %v1131_v35 = vpop.f32.mrb[24].mxu0 }
 0x116   : > { %883 = vst.msk [vmem:[%s1386_s25 + $0x1b0] sm:$0xff] %vm828_vm2, %v780_v34  ;;  %v1179_v36 = vpop.f32.mrb[24].mxu1  ;;  %v635_v37 = vadd.f32 %v1131_v35, %v1379_v1  ;;  %v629_v39 = vpop.f32.mrb[25].mxu0 }
 0x117   : > { %v795_v38 = vadd.f32 %v1179_v36, %v1379_v1  ;;  %v789_v40 = vpop.f32.mrb[25].mxu1  ;;  %v630_v41 = vadd.f32 %v1379_v1, %v629_v39 }
 0x118   : > { %v790_v42 = vadd.f32 %v1379_v1, %v789_v40  ;;  %854 = vst.msk [vmem:[%s1386_s25 + $0xc8] sm:$0xff] %vm828_vm2, %v635_v37 }
 0x119   : > { %886 = vst.msk [vmem:[%s1386_s25 + $0x1c8] sm:$0xff] %vm828_vm2, %v795_v38  ;;  %853 = vst.msk [vmem:[%s1386_s25 + $0xc0] sm:$0xff] %vm828_vm2, %v630_v41  ;;  %v1134_v43 = vpop.f32.mrb[26].mxu0 }
 0x11a   : > { %885 = vst.msk [vmem:[%s1386_s25 + $0x1c0] sm:$0xff] %vm828_vm2, %v790_v42  ;;  %v1182_v44 = vpop.f32.mrb[26].mxu1  ;;  %v645_v45 = vadd.f32 %v1134_v43, %v1379_v1  ;;  %v639_v47 = vpop.f32.mrb[27].mxu0 }
 0x11b   : > { %v805_v46 = vadd.f32 %v1182_v44, %v1379_v1  ;;  %v799_v48 = vpop.f32.mrb[27].mxu1  ;;  %v640_v49 = vadd.f32 %v1379_v1, %v639_v47 }
 0x11c   : > { %v800_v50 = vadd.f32 %v1379_v1, %v799_v48  ;;  %856 = vst.msk [vmem:[%s1386_s25 + $0xd8] sm:$0xff] %vm828_vm2, %v645_v45 }
 0x11d   : > { %888 = vst.msk [vmem:[%s1386_s25 + $0x1d8] sm:$0xff] %vm828_vm2, %v805_v46  ;;  %855 = vst.msk [vmem:[%s1386_s25 + $0xd0] sm:$0xff] %vm828_vm2, %v640_v49  ;;  %v1137_v51 = vpop.f32.mrb[28].mxu0 }
 0x11e   : > { %887 = vst.msk [vmem:[%s1386_s25 + $0x1d0] sm:$0xff] %vm828_vm2, %v800_v50  ;;  %v1185_v52 = vpop.f32.mrb[28].mxu1  ;;  %v655_v53 = vadd.f32 %v1137_v51, %v1379_v1  ;;  %v649_v55 = vpop.f32.mrb[29].mxu0 }
 0x11f   : > { %v815_v54 = vadd.f32 %v1185_v52, %v1379_v1  ;;  %v809_v56 = vpop.f32.mrb[29].mxu1  ;;  %v650_v57 = vadd.f32 %v1379_v1, %v649_v55 }
 0x120   : > { %v810_v58 = vadd.f32 %v1379_v1, %v809_v56  ;;  %858 = vst.msk [vmem:[%s1386_s25 + $0xe8] sm:$0xff] %vm828_vm2, %v655_v53 }
 0x121   : > { %890 = vst.msk [vmem:[%s1386_s25 + $0x1e8] sm:$0xff] %vm828_vm2, %v815_v54  ;;  %857 = vst.msk [vmem:[%s1386_s25 + $0xe0] sm:$0xff] %vm828_vm2, %v650_v57  ;;  %v1140_v59 = vpop.f32.mrb[30].mxu0 }
 0x122   : > { %889 = vst.msk [vmem:[%s1386_s25 + $0x1e0] sm:$0xff] %vm828_vm2, %v810_v58  ;;  %v1188_v60 = vpop.f32.mrb[30].mxu1  ;;  %v665_v61 = vadd.f32 %v1140_v59, %v1379_v1  ;;  %v659_v63 = vpop.f32.mrb[31].mxu0 }
 0x123   : > { %v825_v62 = vadd.f32 %v1188_v60, %v1379_v1  ;;  %v819_v0 = vpop.f32.mrb[31].mxu1  ;;  %v660_v2 = vadd.f32 %v1379_v1, %v659_v63 }
 0x124   : > { %v820_v3 = vadd.f32 %v1379_v1, %v819_v0  ;;  %860 = vst.msk [vmem:[%s1386_s25 + $0xf8] sm:$0xff] %vm828_vm2, %v665_v61 }
 0x125   : > { %892 = vst.msk [vmem:[%s1386_s25 + $0x1f8] sm:$0xff] %vm828_vm2, %v825_v62  ;;  %859 = vst.msk [vmem:[%s1386_s25 + $0xf0] sm:$0xff] %vm828_vm2, %v660_v2 }
 0x126   : > { %891 = vst.msk [vmem:[%s1386_s25 + $0x1f0] sm:$0xff] %vm828_vm2, %v820_v3 }
 0x127 PF: > { %s13_s12 = sadd.s32 1, %s1205_s12  }
 0x128   : > { %p10_p4 = scmp.ge.s32.totalorder %s13_s12, 5  }
 0x12a   :  { %12 = sbr.rel (!%p10_p4) target bundleno = 1 (0x1), region = 62 }

</bundles_post_ra>
